<compile_context>
chip_gen: v6e
topology: v6e:2x2x1
jax: 0.10.0
libtpu: 0.0.40
codegen_flags: <defaults>
</compile_context>

<pallas_src>
import jax
import jax.numpy as jnp
from jax.experimental import pallas as pl
from jax.experimental.pallas import tpu as pltpu


def _round_up(n, m):
    return ((n + m - 1) // m) * m


def _mlp_kernel(x_ref, w1_ref, b1_ref, w2_ref, b2_ref, w3_ref, b3_ref, o_ref):
    # One batch tile per grid step; weights/biases are VMEM-resident blocks.
    x = x_ref[...]                                        # (TILE_B, 10) f32

    # Linear(10, 50) + ReLU
    h1 = jnp.dot(x, w1_ref[...], preferred_element_type=jnp.float32)
    h1 = jnp.maximum(h1 + b1_ref[...], 0.0)               # (TILE_B, 50)

    # Linear(50, 10) + ReLU
    h2 = jnp.dot(h1, w2_ref[...], preferred_element_type=jnp.float32)
    h2 = jnp.maximum(h2 + b2_ref[...], 0.0)               # (TILE_B, 10)

    # Linear(10, 1)  (no activation, matches the PyTorch module)
    out = jnp.dot(h2, w3_ref[...], preferred_element_type=jnp.float32)
    out = out + b3_ref[...]                                # (TILE_B, 1)

    # Lane-dense store: (TILE_B, 1) row-major == (TILE_B//128, 128) row-major.
    # One cheap in-kernel relayout buys full-lane vst + a dense output DMA.
    o_ref[...] = out.reshape(o_ref.shape)


def simple_model_forward(x, params, *, tile_b=2048):
    """Run the fused, batch-tiled MLP Pallas kernel.

    x: (B, 10) float32
    params: dict with w1 (10,50), b1 (1,50), w2 (50,10), b2 (1,10),
            w3 (10,1), b3 (1,1), all float32 (w stored as (in, out)).
    returns: (B, 1) float32 logits
    """
    assert tile_b % 1024 == 0, "tile_b must be a multiple of 1024"
    B, F = x.shape
    assert F == 10, f"expected 10 input features, got {F}"

    w1, b1 = params["w1"], params["b1"]
    w2, b2 = params["w2"], params["b2"]
    w3, b3 = params["w3"], params["b3"]

    # Tile the batch: tile is a multiple of 128 (for the lane-dense output
    # trick) and divides the padded batch exactly.
    tile = min(tile_b, _round_up(B, 128))
    b_pad = _round_up(B, tile)
    if b_pad != B:
        x = jnp.pad(x, ((0, b_pad - B), (0, 0)))   # zero rows -> finite junk, sliced off below
    n_tiles = b_pad // tile
    m = tile // 128                                # rows of the output slab per step

    const = lambda i: (0, 0)                       # weights/biases: resident across the grid

    flops = 2 * (10 * 50 + 50 * 10 + 10 * 1) * b_pad
    param_bytes = sum(int(a.size) * 4 for a in (w1, b1, w2, b2, w3, b3))
    bytes_accessed = b_pad * 10 * 4 + b_pad * 4 + param_bytes

    out2d = pl.pallas_call(
        _mlp_kernel,
        out_shape=jax.ShapeDtypeStruct((b_pad // 128, 128), jnp.float32),
        grid=(n_tiles,),
        in_specs=[
            pl.BlockSpec((tile, 10), lambda i: (i, 0)),   # x: one batch tile per step
            pl.BlockSpec((10, 50), const),
            pl.BlockSpec((1, 50), const),
            pl.BlockSpec((50, 10), const),
            pl.BlockSpec((1, 10), const),
            pl.BlockSpec((10, 1), const),
            pl.BlockSpec((1, 1), const),
        ],
        out_specs=pl.BlockSpec((m, 128), lambda i: (i, 0)),
        compiler_params=pltpu.CompilerParams(
            dimension_semantics=("parallel",)),
        cost_estimate=pl.CostEstimate(
            flops=flops, transcendentals=0, bytes_accessed=bytes_accessed),
    )(x, w1, b1, w2, b2, w3, b3)

    out = out2d.reshape(b_pad, 1)                  # free: row-major bit-identical
    return out[:B] if b_pad != B else out


def init_params(key):
    """Deterministic parameter init (PyTorch-Linear-style uniform bounds)."""
    ks = jax.random.split(key, 6)

    def linear(kw, kb, fan_in, fan_out):
        bound = 1.0 / jnp.sqrt(jnp.float32(fan_in))
        w = jax.random.uniform(kw, (fan_in, fan_out), jnp.float32, -bound, bound)
        b = jax.random.uniform(kb, (1, fan_out), jnp.float32, -bound, bound)
        return w, b

    w1, b1 = linear(ks[0], ks[1], 10, 50)
    w2, b2 = linear(ks[2], ks[3], 50, 10)
    w3, b3 = linear(ks[4], ks[5], 10, 1)
    return {"w1": w1, "b1": b1, "w2": w2, "b2": b2, "w3": w3, "b3": b3}


def reference_forward(x, p):
    h1 = jnp.maximum(x @ p["w1"] + p["b1"], 0.0)
    h2 = jnp.maximum(h1 @ p["w2"] + p["b2"], 0.0)
    return h2 @ p["w3"] + p["b3"]


# TODO(synk): compute_loss (nn.MSELoss) is not part of forward(); a plain
# jnp.mean((pred - real) ** 2) would cover it if needed.

if __name__ == "__main__":
    key = jax.random.PRNGKey(0)
    k_param, k_x1, k_x2 = jax.random.split(key, 3)

    params = init_params(k_param)

    # Small demo batch (single tile, exercises the padding path: 8 -> 128).
    x_small = jax.random.normal(k_x1, (8, 10), dtype=jnp.float32)
    out_small = jax.block_until_ready(simple_model_forward(x_small, params))
    ref_small = reference_forward(x_small, params)
    assert out_small.shape == (8, 1), out_small.shape
    assert jnp.allclose(out_small, ref_small, atol=1e-5, rtol=1e-5), "small-batch mismatch"

    # Multi-tile batch (exercises the pipelined grid + resident weights).
    x_big = jax.random.normal(k_x2, (2500, 10), dtype=jnp.float32)
    out_big = jax.block_until_ready(simple_model_forward(x_big, params, tile_b=1024))
    ref_big = reference_forward(x_big, params)
    assert out_big.shape == (2500, 1), out_big.shape
    assert jnp.allclose(out_big, ref_big, atol=1e-5, rtol=1e-5), "multi-tile mismatch"

    print("KERNEL_OK")
</pallas_src>

<mosaic_0001>
module attributes {stable_mosaic.version = 11 : i64} {
  func.func @_mlp_kernel(%arg0: i32, %arg1: memref<128x10xf32, #tpu.memory_space<vmem>>, %arg2: memref<10x50xf32, #tpu.memory_space<vmem>>, %arg3: memref<1x50xf32, #tpu.memory_space<vmem>>, %arg4: memref<50x10xf32, #tpu.memory_space<vmem>>, %arg5: memref<1x10xf32, #tpu.memory_space<vmem>>, %arg6: memref<10x1xf32, #tpu.memory_space<vmem>>, %arg7: memref<1x1xf32, #tpu.memory_space<vmem>>, %arg8: memref<1x128xf32, #tpu.memory_space<vmem>>) attributes {dimension_semantics = [#tpu.dimension_semantics<parallel>], iteration_bounds = array<i64: 1>, scalar_prefetch = 0 : i64, scratch_operands = 0 : i64, tpu.core_type = #tpu.core_type<tc>, window_params = [{transform_indices = @transform_0, window_bounds = array<i64: 128, 10>}, {pipeline_mode = #tpu.pipeline_mode<synchronous>, transform_indices = @transform_1, window_bounds = array<i64: 10, 50>}, {pipeline_mode = #tpu.pipeline_mode<synchronous>, transform_indices = @transform_2, window_bounds = array<i64: 1, 50>}, {pipeline_mode = #tpu.pipeline_mode<synchronous>, transform_indices = @transform_3, window_bounds = array<i64: 50, 10>}, {pipeline_mode = #tpu.pipeline_mode<synchronous>, transform_indices = @transform_4, window_bounds = array<i64: 1, 10>}, {pipeline_mode = #tpu.pipeline_mode<synchronous>, transform_indices = @transform_5, window_bounds = array<i64: 10, 1>}, {pipeline_mode = #tpu.pipeline_mode<synchronous>, transform_indices = @transform_6, window_bounds = array<i64: 1, 1>}, {transform_indices = @transform_7, window_bounds = array<i64: 1, 128>}]} {
    %c0 = arith.constant 0 : index
    %c0_0 = arith.constant 0 : index
    %0 = vector.load %arg1[%c0, %c0_0] : memref<128x10xf32, #tpu.memory_space<vmem>>, vector<128x10xf32>
    %c0_1 = arith.constant 0 : index
    %c0_2 = arith.constant 0 : index
    %1 = vector.load %arg2[%c0_1, %c0_2] : memref<10x50xf32, #tpu.memory_space<vmem>>, vector<10x50xf32>
    %cst = arith.constant dense<0.000000e+00> : vector<128x50xf32>
    %2 = tpu.matmul %0, %1, %cst {dimension_numbers = #tpu.dot_dimension_numbers<[1], [0], [0], [1], [0, 0, 1, 1], [], []>} : vector<128x10xf32>, vector<10x50xf32>, vector<128x50xf32> -> vector<128x50xf32>
    %c0_3 = arith.constant 0 : index
    %c0_4 = arith.constant 0 : index
    %3 = vector.load %arg3[%c0_3, %c0_4] : memref<1x50xf32, #tpu.memory_space<vmem>>, vector<1x50xf32>
    %4 = vector.broadcast %3 : vector<1x50xf32> to vector<128x50xf32>
    %5 = arith.addf %2, %4 : vector<128x50xf32>
    %cst_5 = arith.constant 0.000000e+00 : f32
    %6 = vector.broadcast %cst_5 : f32 to vector<128x50xf32>
    %7 = arith.maximumf %5, %6 : vector<128x50xf32>
    %c0_6 = arith.constant 0 : index
    %c0_7 = arith.constant 0 : index
    %8 = vector.load %arg4[%c0_6, %c0_7] : memref<50x10xf32, #tpu.memory_space<vmem>>, vector<50x10xf32>
    %cst_8 = arith.constant dense<0.000000e+00> : vector<128x10xf32>
    %9 = tpu.matmul %7, %8, %cst_8 {dimension_numbers = #tpu.dot_dimension_numbers<[1], [0], [0], [1], [0, 0, 1, 1], [], []>} : vector<128x50xf32>, vector<50x10xf32>, vector<128x10xf32> -> vector<128x10xf32>
    %c0_9 = arith.constant 0 : index
    %c0_10 = arith.constant 0 : index
    %10 = vector.load %arg5[%c0_9, %c0_10] : memref<1x10xf32, #tpu.memory_space<vmem>>, vector<1x10xf32>
    %11 = vector.broadcast %10 : vector<1x10xf32> to vector<128x10xf32>
    %12 = arith.addf %9, %11 : vector<128x10xf32>
    %cst_11 = arith.constant 0.000000e+00 : f32
    %13 = vector.broadcast %cst_11 : f32 to vector<128x10xf32>
    %14 = arith.maximumf %12, %13 : vector<128x10xf32>
    %c0_12 = arith.constant 0 : index
    %c0_13 = arith.constant 0 : index
    %15 = vector.load %arg6[%c0_12, %c0_13] : memref<10x1xf32, #tpu.memory_space<vmem>>, vector<10x1xf32>
    %cst_14 = arith.constant dense<0.000000e+00> : vector<128x1xf32>
    %16 = tpu.matmul %14, %15, %cst_14 {dimension_numbers = #tpu.dot_dimension_numbers<[1], [0], [0], [1], [0, 0, 1, 1], [], []>} : vector<128x10xf32>, vector<10x1xf32>, vector<128x1xf32> -> vector<128x1xf32>
    %c0_15 = arith.constant 0 : index
    %c0_16 = arith.constant 0 : index
    %17 = vector.load %arg7[%c0_15, %c0_16] : memref<1x1xf32, #tpu.memory_space<vmem>>, vector<1x1xf32>
    %18 = vector.broadcast %17 : vector<1x1xf32> to vector<128x1xf32>
    %19 = arith.addf %16, %18 : vector<128x1xf32>
    %20 = vector.shape_cast %19 : vector<128x1xf32> to vector<1x128xf32>
    %c0_17 = arith.constant 0 : index
    %c0_18 = arith.constant 0 : index
    %21 = vector.load %arg8[%c0_17, %c0_18] : memref<1x128xf32, #tpu.memory_space<vmem>>, vector<1x128xf32>
    tpu.vector_store %arg8[%c0_17, %c0_18], %20 {strides = array<i32>} : memref<1x128xf32, #tpu.memory_space<vmem>>, vector<1x128xf32>,
    return
  }
  func.func @transform_0(%arg0: i32) -> (i32, i32) {
    %c0_i32 = arith.constant 0 : i32
    %c0_i32_0 = arith.constant 0 : i32
    return %arg0, %c0_i32 : i32, i32
  }
  func.func @transform_1(%arg0: i32) -> (i32, i32) {
    %c0_i32 = arith.constant 0 : i32
    %c0_i32_0 = arith.constant 0 : i32
    %c0_i32_1 = arith.constant 0 : i32
    return %c0_i32, %c0_i32_0 : i32, i32
  }
  func.func @transform_2(%arg0: i32) -> (i32, i32) {
    %c0_i32 = arith.constant 0 : i32
    %c0_i32_0 = arith.constant 0 : i32
    %c0_i32_1 = arith.constant 0 : i32
    return %c0_i32, %c0_i32_0 : i32, i32
  }
  func.func @transform_3(%arg0: i32) -> (i32, i32) {
    %c0_i32 = arith.constant 0 : i32
    %c0_i32_0 = arith.constant 0 : i32
    %c0_i32_1 = arith.constant 0 : i32
    return %c0_i32, %c0_i32_0 : i32, i32
  }
  func.func @transform_4(%arg0: i32) -> (i32, i32) {
    %c0_i32 = arith.constant 0 : i32
    %c0_i32_0 = arith.constant 0 : i32
    %c0_i32_1 = arith.constant 0 : i32
    return %c0_i32, %c0_i32_0 : i32, i32
  }
  func.func @transform_5(%arg0: i32) -> (i32, i32) {
    %c0_i32 = arith.constant 0 : i32
    %c0_i32_0 = arith.constant 0 : i32
    %c0_i32_1 = arith.constant 0 : i32
    return %c0_i32, %c0_i32_0 : i32, i32
  }
  func.func @transform_6(%arg0: i32) -> (i32, i32) {
    %c0_i32 = arith.constant 0 : i32
    %c0_i32_0 = arith.constant 0 : i32
    %c0_i32_1 = arith.constant 0 : i32
    return %c0_i32, %c0_i32_0 : i32, i32
  }
  func.func @transform_7(%arg0: i32) -> (i32, i32) {
    %c0_i32 = arith.constant 0 : i32
    %c0_i32_0 = arith.constant 0 : i32
    return %arg0, %c0_i32 : i32, i32
  }
}

</mosaic_0001>

<bundles_post_ra>
// kernel: tpu_custom_call.1
= control target key start
LH: loop header
LB: loop body
LE: loop exit
PB: predicated region body
PF: predicated region fallthrough
CT: control target
= control target key end

     0   :  { %s1355_s0 = inlined_call_operand.vmem [shape: f32[128,10], index: 0, kind: input, shape index: {}]   ;;  %s1356_s1 = inlined_call_operand.vmem [shape: f32[10,50], index: 1, kind: input, shape index: {}]   ;;  %s1357_s2 = inlined_call_operand.vmem [shape: f32[1,50], index: 2, kind: input, shape index: {}]   ;;  %s1358_s3 = inlined_call_operand.vmem [shape: f32[50,10], index: 3, kind: input, shape index: {}]   ;;  %s1359_s4 = inlined_call_operand.vmem [shape: f32[1,10], index: 4, kind: input, shape index: {}]   ;;  %s1360_s5 = inlined_call_operand.vmem [shape: f32[10,1], index: 5, kind: input, shape index: {}]   ;;  %s1361_s6 = inlined_call_operand.<no memory space> [shape: f32[1,1], index: 6, kind: input, shape index: {}]   ;;  %s1362_s7 = inlined_call_operand.hbm [shape: f32[1,128], index: 7, kind: output, shape index: {}]  }
   0x1   :  { %v12_v0 = vstv %s1361_s6 }
   0x2   :  { %13 = vst [vmem:[#allocation2] sm:$0x1] %v12_v0 }
   0x3   :  { %v46_v1 = vld [vmem:[%s1356_s1 + $0x8] sm:$0x3]  ;;  %vm103_vm0 = vcmask 1041408   ;;  %v45_v2 = vld [vmem:[%s1356_s1] sm:$0xff]  ;;  %vm54_vm1 = vcmask 80896   ;;  %v31_v5 = vld [vmem:[%s1355_s0 + $0x10] sm:$0xff] }
   0x4   :  { %v29_v3 = vld [vmem:[%s1355_s0] sm:$0xff]  ;;  %1004 = vmatprep.subr.msk.mxu0 %vm103_vm0, %v46_v1  ;;  %v30_v4 = vld [vmem:[%s1355_s0 + $0x8] sm:$0xff]  ;;  %1098 = vmatprep.subr.msk.mxu1 %vm103_vm0, %v46_v1  ;;  %v39_v8 = vld [vmem:[%s1355_s0 + $0x50] sm:$0xff] }
   0x5   :  { %1008 = vmatprep.mubr.msk.f32.mxu0 %vm54_vm1, %v29_v3  ;;  %1005 = vmatpush3.msk.msra.mxu0 %vm103_vm0, %v46_v1  ;;  %v37_v6 = vld [vmem:[%s1355_s0 + $0x40] sm:$0xff]  ;;  %v38_v7 = vld [vmem:[%s1355_s0 + $0x48] sm:$0xff]  ;;  %v32_v9 = vld [vmem:[%s1355_s0 + $0x18] sm:$0xff] }
   0x6   :  { %1006 = vmatprep.subr.mxu0 %v45_v2  ;;  %1100 = vmatpush3.msk.msra.mxu1 %vm103_vm0, %v46_v1  ;;  %v274_v10 = vld [vmem:[%s1358_s3 + $0x30] sm:$0x3]  ;;  %v273_v11 = vld [vmem:[%s1358_s3 + $0x28] sm:$0xff]  ;;  %v33_v12 = vld [vmem:[%s1355_s0 + $0x20] sm:$0xff] }
   0x7   :  { %1007 = vmatpush3.msra.mxu0 %v45_v2  ;;  %1099 = vmatprep.subr.mxu1 %v45_v2 }
   0x8   :  { %1009 = vmatmul.mubr.msk.f32.vlgmr.msra.gmra.mxu0 %vm54_vm1, %v30_v4  ;;  %1101 = vmatpush3.msra.mxu1 %v45_v2 }
   0x9   :  { %1011 = vmatprep.mubr.msk.f32.mxu0 %vm54_vm1, %v31_v5  ;;  %1020 = vmatprep.mubr.msk.f32.mxu1 %vm54_vm1, %v37_v6 }
   0xa   :  { %1021 = vmatmul.mubr.msk.f32.vlgmr.msra.gmra.mxu1 %vm54_vm1, %v38_v7  ;;  %1032 = vmatprep.subr.msk.mxu1 %vm103_vm0, %v274_v10 }
   0xb   :  { %14 = vsyncpa [#allocation4], 0  ;;  %1023 = vmatprep.mubr.msk.f32.mxu1 %vm54_vm1, %v39_v8  ;;  %v40_v13 = vld [vmem:[%s1355_s0 + $0x58] sm:$0xff]  ;;  %1033 = vmatpush3.msk.msra.mxu1 %vm103_vm0, %v274_v10  ;;  %v272_v14 = vld [vmem:[%s1358_s3 + $0x20] sm:$0xff]  ;;  %vm282_vm2 = vcmask 408576   ;;  %vm775_vm3 = vcmask 130112  }
   0xc   :  { %1012 = vmatmul.mubr.msk.f32.gmra.mxu0 %vm54_vm1, %v32_v9  ;;  %v41_v15 = vld [vmem:[%s1355_s0 + $0x60] sm:$0xff]  ;;  %1034 = vmatprep.subr.mxu1 %v273_v11  ;;  %v34_v16 = vld [vmem:[%s1355_s0 + $0x28] sm:$0xff]  ;;  %v271_v17 = vld [vmem:[%s1358_s3 + $0x18] sm:$0xff]  ;;  %vm782_vm4 = vcmask 195712   ;;  %vm789_vm5 = vcmask 261312   ;;  %vm796_vm6 = vcmask 326912  }
   0xd   :  { %1014 = vmatprep.mubr.msk.f32.mxu0 %vm54_vm1, %v33_v12  ;;  %1035 = vmatpush3.msra.mxu1 %v273_v11  ;;  %v35_v18 = vld [vmem:[%s1355_s0 + $0x30] sm:$0xff]  ;;  %v42_v19 = vld [vmem:[%s1355_s0 + $0x68] sm:$0xff]  ;;  %v36_v21 = vld [vmem:[%s1355_s0 + $0x38] sm:$0xff]  ;;  %vm803_vm7 = vcmask 392512   ;;  %vm810_vm8 = vcmask 458112   ;;  %vm817_vm9 = vcmask 523712  }
   0xe   :  { %1024 = vmatmul.mubr.msk.f32.gmra.mxu1 %vm54_vm1, %v40_v13  ;;  %1036 = vmatprep.subr.mxu1 %v272_v14  ;;  %v43_v20 = vld [vmem:[%s1355_s0 + $0x70] sm:$0xff]  ;;  %v44_v22 = vld [vmem:[%s1355_s0 + $0x78] sm:$0xff]  ;;  %v269_v24 = vld [vmem:[%s1358_s3 + $0x8] sm:$0xff]  ;;  %vm824_vm10 = vcmask 589312   ;;  %vm831_vm11 = vcmask 654912   ;;  %vm838_vm12 = vcmask 720512  }
   0xf   :  { %1026 = vmatprep.mubr.msk.f32.mxu1 %vm54_vm1, %v41_v15  ;;  %1037 = vmatpush3.msra.mxu1 %v272_v14  ;;  %v270_v23 = vld [vmem:[%s1358_s3 + $0x10] sm:$0xff]  ;;  %v268_v25 = vld [vmem:[%s1358_s3] sm:$0xff]  ;;  %v496_v26 = vld [vmem:[%s1360_s5 + $0x8] sm:$0x3]  ;;  %vm845_vm13 = vcmask 786112   ;;  %vm852_vm14 = vcmask 851712  }
  0x10   :  { %1015 = vmatmul.mubr.msk.f32.gmra.mxu0 %vm54_vm1, %v34_v16  ;;  %1038 = vmatprep.subr.mxu1 %v271_v17  ;;  %v495_v27 = vld [vmem:[%s1360_s5] sm:$0xff]  ;;  %vm859_vm15 = vcmask 917312  }
  0x11   :  { %1017 = vmatprep.mubr.msk.f32.mxu0 %vm54_vm1, %v35_v18  ;;  %1039 = vmatpush3.msra.mxu1 %v271_v17  ;;  %v891_v28 = vld [vmem:[%s1357_s2] ss:$0 sm:$0xff] }
  0x12   :  { %1027 = vmatmul.mubr.msk.f32.gmra.mxu1 %vm54_vm1, %v42_v19  ;;  %1040 = vmatprep.subr.mxu1 %v270_v23  ;;  %v909_v13 = vld [vmem:[%s1359_s4] ss:$0 sm:$0xff]  ;;  %s1129_s4 = smov [#allocation3]  }
  0x13   :  { %1029 = vmatprep.mubr.msk.f32.mxu1 %vm54_vm1, %v43_v20  ;;  %1041 = vmatpush3.msra.mxu1 %v270_v23  ;;  %s883_s5 = sshll.u32 %s1129_s4, 4  ;;  %s884_s5 = int_to_ptr.vmem [resolvable:$true] %s883_s5 }
  0x14   :  { %1018 = vmatmul.mubr.msk.f32.gmra.mxu0 %vm54_vm1, %v36_v21  ;;  %1042 = vmatprep.subr.mxu1 %v269_v24  ;;  %s1106_s8 = scalar_lea.vmem %s884_s5, 16  ;;  %s1110_s6 = scalar_lea.vmem %s884_s5, 32 }
  0x15   :  { %1043 = vmatpush3.msra.mxu1 %v269_v24  ;;  %1070 = vmatprep.subr.msk.mxu0 %vm103_vm0, %v496_v26  ;;  %p1107_p0 = scmp.ne.s32.totalorder %s884_s5, %s1106_s8  ;;  %p1111_p1 = scmp.lt.s32.totalorder %s884_s5, %s884_s5 }
  0x16   :  { %1030 = vmatmul.mubr.msk.f32.gmra.mxu1 %vm54_vm1, %v44_v22  ;;  %1044 = vmatprep.subr.mxu1 %v268_v25  ;;  %p1112_p2 = scmp.lt.s32.totalorder %s1110_s6, %s1106_s8 }
  0x17   :  { %1045 = vmatpush3.msra.mxu1 %v268_v25  ;;  %1071 = vmatpush3.msk.msra.mxu0 %vm103_vm0, %v496_v26  ;;  %vm866_vm0 = vcmask 982912  }
  0x18   :  { %1072 = vmatprep.subr.mxu0 %v495_v27  ;;  %p1113_p3 = por %p1112_p2, %p1111_p1 }
  0x19   :  { %1073 = vmatpush3.msra.mxu0 %v495_v27 }
  0x1a   :  { %p1114_p4 = pnand %p1113_p3, %p1107_p0 }
  0xc8   :  { %v1010_v29 = vpop.f32.mrf.mxu0 }
  0xc9   :  { %v179_v30 = vadd.f32 %v1010_v29, %v891_v28 }
  0xca   :  { %v173_v31 = vpop.f32.mrf.mxu0  ;;  %v1022_v32 = vpop.f32.mrf.mxu1 }
  0xcb   :  { %v174_v33 = vadd.f32 %v891_v28, %v173_v31  ;;  %v253_v37 = vmax.f32 %v179_v30, 0.0  ;;  %v219_v62 = vadd.f32 %v1022_v32, %v891_v28 }
  0xcc   :  { %v1013_v34 = vpop.f32.mrf.mxu0  ;;  %v213_v35 = vpop.f32.mrf.mxu1 }
  0xcd   :  { %v252_v36 = vmax.f32 %v174_v33, 0.0  ;;  %v189_v38 = vadd.f32 %v1013_v34, %v891_v28  ;;  %v214_v52 = vadd.f32 %v891_v28, %v213_v35  ;;  %v261_v2 = vmax.f32 %v219_v62, 0.0 }
  0xce   :  { %v183_v39 = vpop.f32.mrf.mxu0  ;;  %v1025_v40 = vpop.f32.mrf.mxu1  ;;  %v1128_v62 = vmov 0  }
  0xcf   :  { %v184_v41 = vadd.f32 %v891_v28, %v183_v39  ;;  %1046 = vmatprep.mubr.msk.f32.mxu1 %vm282_vm2, %v252_v36  ;;  %v255_v45 = vmax.f32 %v189_v38, 0.0  ;;  %v260_v59 = vmax.f32 %v214_v52, 0.0  ;;  %v229_v3 = vadd.f32 %v1025_v40, %v891_v28  ;;  %1104 = vset.pattern.permute.xlu0 %v1128_v62 }
  0xd0   :  { %v1016_v42 = vpop.f32.mrf.mxu0  ;;  %1047 = vmatmul.mubr.msk.f32.vlgmr.msra.gmra.mxu1 %vm282_vm2, %v253_v37  ;;  %v223_v43 = vpop.f32.mrf.mxu1  ;;  %1105 = vset.pattern.permute.xlu1 %v1128_v62 }
  0xd1   :  { %v254_v44 = vmax.f32 %v184_v41, 0.0  ;;  %v199_v46 = vadd.f32 %v1016_v42, %v891_v28  ;;  %v224_v60 = vadd.f32 %v891_v28, %v223_v43  ;;  %v263_v7 = vmax.f32 %v229_v3, 0.0 }
  0xd2   :  { %v193_v47 = vpop.f32.mrf.mxu0  ;;  %v1028_v48 = vpop.f32.mrf.mxu1 }
  0xd3   :  { %v194_v49 = vadd.f32 %v891_v28, %v193_v47  ;;  %1049 = vmatprep.mubr.msk.f32.mxu1 %vm282_vm2, %v254_v44  ;;  %v257_v53 = vmax.f32 %v199_v46, 0.0  ;;  %v262_v0 = vmax.f32 %v224_v60, 0.0  ;;  %v239_v8 = vadd.f32 %v1028_v48, %v891_v28 }
  0xd4   :  { %v1019_v50 = vpop.f32.mrf.mxu0  ;;  %1050 = vmatmul.mubr.msk.f32.gmra.mxu1 %vm282_vm2, %v255_v45  ;;  %v233_v56 = vpop.f32.mrf.mxu1 }
  0xd5   :  { %v256_v51 = vmax.f32 %v194_v49, 0.0  ;;  %v209_v54 = vadd.f32 %v1019_v50, %v891_v28  ;;  %v234_v1 = vadd.f32 %v891_v28, %v233_v56  ;;  %v265_v10 = vmax.f32 %v239_v8, 0.0 }
  0xd6   :  { %v203_v55 = vpop.f32.mrf.mxu0  ;;  %v1031_v63 = vpop.f32.mrf.mxu1 }
  0xd7   :  { %v204_v57 = vadd.f32 %v891_v28, %v203_v55  ;;  %1052 = vmatprep.mubr.msk.f32.mxu1 %vm282_vm2, %v256_v51  ;;  %v259_v61 = vmax.f32 %v209_v54, 0.0  ;;  %v264_v5 = vmax.f32 %v234_v1, 0.0  ;;  %v249_v11 = vadd.f32 %v1031_v63, %v891_v28  ;;  %v927_v63 = vld [vmem:[#allocation2] ss:$0 sm:$0xff] }
  0xd8   :  { %1053 = vmatmul.mubr.msk.f32.gmra.mxu1 %vm282_vm2, %v257_v53  ;;  %v243_v4 = vpop.f32.mrf.mxu1 }
  0xd9   :  { %v258_v58 = vmax.f32 %v204_v57, 0.0  ;;  %v244_v6 = vadd.f32 %v891_v28, %v243_v4  ;;  %v267_v12 = vmax.f32 %v249_v11, 0.0 }
  0xdb   :  { %1055 = vmatprep.mubr.msk.f32.mxu1 %vm282_vm2, %v258_v58  ;;  %v266_v9 = vmax.f32 %v244_v6, 0.0 }
  0xdc   :  { %1056 = vmatmul.mubr.msk.f32.gmra.mxu1 %vm282_vm2, %v259_v61 }
  0xdd   :  { %1058 = vmatprep.mubr.msk.f32.mxu1 %vm282_vm2, %v260_v59 }
  0xe0   :  { %1059 = vmatmul.mubr.msk.f32.gmra.mxu1 %vm282_vm2, %v261_v2 }
  0xe1   :  { %1061 = vmatprep.mubr.msk.f32.mxu1 %vm282_vm2, %v262_v0 }
  0xe4   :  { %1062 = vmatmul.mubr.msk.f32.gmra.mxu1 %vm282_vm2, %v263_v7 }
  0xe5   :  { %1064 = vmatprep.mubr.msk.f32.mxu1 %vm282_vm2, %v264_v5 }
  0xe8   :  { %1065 = vmatmul.mubr.msk.f32.gmra.mxu1 %vm282_vm2, %v265_v10 }
  0xe9   :  { %1067 = vmatprep.mubr.msk.f32.mxu1 %vm282_vm2, %v266_v9 }
  0xec   :  { %1068 = vmatmul.mubr.msk.f32.gmra.mxu1 %vm282_vm2, %v267_v12 }
 0x190   :  { %v1048_v14 = vpop.f32.mrf.mxu1 }
 0x191   :  { %v406_v15 = vadd.f32 %v1048_v14, %v909_v13 }
 0x192   :  { %v400_v16 = vpop.f32.mrf.mxu1 }
 0x193   :  { %v401_v17 = vadd.f32 %v909_v13, %v400_v16  ;;  %v480_v20 = vmax.f32 %v406_v15, 0.0 }
 0x194   :  { %v1051_v18 = vpop.f32.mrf.mxu1 }
 0x195   :  { %v479_v19 = vmax.f32 %v401_v17, 0.0  ;;  %v416_v21 = vadd.f32 %v1051_v18, %v909_v13 }
 0x196   :  { %v410_v22 = vpop.f32.mrf.mxu1 }
 0x197   :  { %v411_v23 = vadd.f32 %v909_v13, %v410_v22  ;;  %1074 = vmatprep.mubr.msk.f32.mxu0 %vm54_vm1, %v479_v19  ;;  %v482_v26 = vmax.f32 %v416_v21, 0.0 }
 0x198   :  { %v1054_v24 = vpop.f32.mrf.mxu1  ;;  %1075 = vmatmul.mubr.msk.f32.vlgmr.msra.gmra.mxu0 %vm54_vm1, %v480_v20 }
 0x199   :  { %v481_v25 = vmax.f32 %v411_v23, 0.0  ;;  %v426_v27 = vadd.f32 %v1054_v24, %v909_v13 }
 0x19a   :  { %v420_v28 = vpop.f32.mrf.mxu1 }
 0x19b   :  { %v421_v29 = vadd.f32 %v909_v13, %v420_v28  ;;  %1077 = vmatprep.mubr.msk.f32.mxu0 %vm54_vm1, %v481_v25  ;;  %v484_v32 = vmax.f32 %v426_v27, 0.0 }
 0x19c   :  { %v1057_v30 = vpop.f32.mrf.mxu1  ;;  %1078 = vmatmul.mubr.msk.f32.gmra.mxu0 %vm54_vm1, %v482_v26 }
 0x19d   :  { %v483_v31 = vmax.f32 %v421_v29, 0.0  ;;  %v436_v33 = vadd.f32 %v1057_v30, %v909_v13 }
 0x19e   :  { %v430_v34 = vpop.f32.mrf.mxu1 }
 0x19f   :  { %v431_v35 = vadd.f32 %v909_v13, %v430_v34  ;;  %1080 = vmatprep.mubr.msk.f32.mxu0 %vm54_vm1, %v483_v31  ;;  %v486_v38 = vmax.f32 %v436_v33, 0.0 }
 0x1a0   :  { %v1060_v36 = vpop.f32.mrf.mxu1  ;;  %1081 = vmatmul.mubr.msk.f32.gmra.mxu0 %vm54_vm1, %v484_v32  ;;  %v764_v32 = vlaneseq }
 0x1a1   :  { %v485_v37 = vmax.f32 %v431_v35, 0.0  ;;  %v446_v39 = vadd.f32 %v1060_v36, %v909_v13 }
 0x1a2   :  { %v440_v40 = vpop.f32.mrf.mxu1  ;;  %v1316_v33 = vand.u32 127, %v764_v32  ;;  %v1318_v34 = vshrl.u32 %v764_v32, 7 }
 0x1a3   :  { %v441_v41 = vadd.f32 %v909_v13, %v440_v40  ;;  %1083 = vmatprep.mubr.msk.f32.mxu0 %vm54_vm1, %v485_v37  ;;  %v488_v44 = vmax.f32 %v446_v39, 0.0 }
 0x1a4   :  { %v1063_v42 = vpop.f32.mrf.mxu1  ;;  %1084 = vmatmul.mubr.msk.f32.gmra.mxu0 %vm54_vm1, %v486_v38  ;;  %v770_v35 = vadd.s32 4294967288, %v1316_v33  ;;  %v777_v37 = vadd.s32 4294967280, %v1316_v33  ;;  %v784_v38 = vadd.s32 4294967272, %v1316_v33  ;;  %v768_v39 = vsub.s32 %v1316_v33, %v1318_v34 }
 0x1a5   :  { %v487_v43 = vmax.f32 %v441_v41, 0.0  ;;  %v456_v45 = vadd.f32 %v1063_v42, %v909_v13  ;;  %v791_v40 = vadd.s32 4294967264, %v1316_v33 }
 0x1a6   :  { %v450_v46 = vpop.f32.mrf.mxu1  ;;  %v773_v41 = vsub.s32 %v770_v35, %v1318_v34  ;;  %v868_v35 = vadd.s32 4294967176, %v1316_v33 }
 0x1a7   :  { %v451_v47 = vadd.f32 %v909_v13, %v450_v46  ;;  %1086 = vmatprep.mubr.msk.f32.mxu0 %vm54_vm1, %v487_v43  ;;  %v490_v50 = vmax.f32 %v456_v45, 0.0  ;;  %v798_v45 = vadd.s32 4294967256, %v1316_v33  ;;  %v787_v46 = vsub.s32 %v784_v38, %v1318_v34 }
 0x1a8   :  { %v1066_v48 = vpop.f32.mrf.mxu1  ;;  %1087 = vmatmul.mubr.msk.f32.gmra.mxu0 %vm54_vm1, %v488_v44  ;;  %v780_v44 = vsub.s32 %v777_v37, %v1318_v34 }
 0x1a9   :  { %v489_v49 = vmax.f32 %v451_v47, 0.0  ;;  %v466_v51 = vadd.f32 %v1066_v48, %v909_v13  ;;  %v794_v48 = vsub.s32 %v791_v40, %v1318_v34 }
 0x1aa   :  { %v460_v52 = vpop.f32.mrf.mxu1 }
 0x1ab   :  { %v461_v53 = vadd.f32 %v909_v13, %v460_v52  ;;  %1089 = vmatprep.mubr.msk.f32.mxu0 %vm54_vm1, %v489_v49  ;;  %v492_v56 = vmax.f32 %v466_v51, 0.0  ;;  %v805_v49 = vadd.s32 4294967248, %v1316_v33 }
 0x1ac   :  { %v1069_v54 = vpop.f32.mrf.mxu1  ;;  %1090 = vmatmul.mubr.msk.f32.gmra.mxu0 %vm54_vm1, %v490_v50 }
 0x1ad   :  { %v491_v55 = vmax.f32 %v461_v53, 0.0  ;;  %v476_v57 = vadd.f32 %v1069_v54, %v909_v13  ;;  %v801_v53 = vsub.s32 %v798_v45, %v1318_v34  ;;  %v812_v54 = vadd.s32 4294967240, %v1316_v33 }
 0x1ae   :  { %v470_v58 = vpop.f32.mrf.mxu1 }
 0x1af   :  { %v471_v59 = vadd.f32 %v909_v13, %v470_v58  ;;  %1092 = vmatprep.mubr.msk.f32.mxu0 %vm54_vm1, %v491_v55  ;;  %v494_v61 = vmax.f32 %v476_v57, 0.0 }
 0x1b0   :  { %1093 = vmatmul.mubr.msk.f32.gmra.mxu0 %vm54_vm1, %v492_v56 }
 0x1b1   :  { %v493_v60 = vmax.f32 %v471_v59, 0.0 }
 0x1b3   :  { %1095 = vmatprep.mubr.msk.f32.mxu0 %vm54_vm1, %v493_v60  ;;  %v808_v60 = vsub.s32 %v805_v49, %v1318_v34 }
 0x1b4   :  { %1096 = vmatmul.mubr.msk.f32.gmra.mxu0 %vm54_vm1, %v494_v61  ;;  %v819_v61 = vadd.s32 4294967232, %v1316_v33  ;;  %vm873_vm1 = vcmask 1048512  }
 0x258   :  { %v1076_v0 = vpop.f32.mrf.mxu0 }
 0x259   :  { %v627_v1 = vadd.f32 %v1076_v0, %v927_v63 }
 0x25a   :  { %v621_v2 = vpop.f32.mrf.mxu0 }
 0x25b   :  { %720 = vperm.xlu0 %1104, %v627_v1   ;;  %v622_v4 = vadd.f32 %v927_v63, %v621_v2  ;;  %v815_v2 = vsub.s32 %v812_v54, %v1318_v34 }
 0x25c   :  { %v1079_v3 = vpop.f32.mrf.mxu0 }
 0x25d   :  { %v637_v5 = vadd.f32 %v1079_v3, %v927_v63  ;;  %v826_v3 = vadd.s32 4294967224, %v1316_v33 }
 0x25e   :  { %v631_v6 = vpop.f32.mrf.mxu0 }
 0x25f   :  { %726 = vperm.xlu1 %1105, %v637_v5   ;;  %717 = vperm.xlu0 %1104, %v622_v4   ;;  %v632_v8 = vadd.f32 %v927_v63, %v631_v6 }
 0x260   :  { %v1082_v7 = vpop.f32.mrf.mxu0 }
 0x261   :  { %v647_v12 = vadd.f32 %v1082_v7, %v927_v63  ;;  %v822_v7 = vsub.s32 %v819_v61, %v1318_v34 }
 0x262   :  { %v641_v9 = vpop.f32.mrf.mxu0 }
 0x263   :  { %v642_v10 = vadd.f32 %v927_v63, %v641_v9  ;;  %723 = vperm.xlu1 %1105, %v632_v8   ;;  %v833_v8 = vadd.s32 4294967216, %v1316_v33 }
 0x264   :  { %v1085_v11 = vpop.f32.mrf.mxu0 }
 0x265   :  { %729 = vperm.xlu0 %1104, %v642_v10   ;;  %v657_v16 = vadd.f32 %v1085_v11, %v927_v63 }
 0x266   :  { %v651_v13 = vpop.f32.mrf.mxu0 }
 0x267   :  { %v652_v14 = vadd.f32 %v927_v63, %v651_v13  ;;  %732 = vperm.xlu1 %1105, %v647_v12   ;;  %v829_v12 = vsub.s32 %v826_v3, %v1318_v34  ;;  %v840_v13 = vadd.s32 4294967208, %v1316_v33 }
 0x268   :  { %v1088_v15 = vpop.f32.mrf.mxu0 }
 0x269   :  { %735 = vperm.xlu0 %1104, %v652_v14   ;;  %v667_v20 = vadd.f32 %v1088_v15, %v927_v63 }
 0x26a   :  { %v661_v17 = vpop.f32.mrf.mxu0 }
 0x26b   :  { %v662_v18 = vadd.f32 %v927_v63, %v661_v17  ;;  %738 = vperm.xlu1 %1105, %v657_v16   ;;  %v836_v17 = vsub.s32 %v833_v8, %v1318_v34 }
 0x26c   :  { %v1091_v19 = vpop.f32.mrf.mxu0 }
 0x26d   :  { %741 = vperm.xlu0 %1104, %v662_v18   ;;  %v677_v24 = vadd.f32 %v1091_v19, %v927_v63  ;;  %v847_v18 = vadd.s32 4294967200, %v1316_v33 }
 0x26e   :  { %v671_v21 = vpop.f32.mrf.mxu0 }
 0x26f   :  { %v672_v22 = vadd.f32 %v927_v63, %v671_v21  ;;  %744 = vperm.xlu1 %1105, %v667_v20  }
 0x270   :  { %v1094_v23 = vpop.f32.mrf.mxu0 }
 0x271   :  { %747 = vperm.xlu0 %1104, %v672_v22   ;;  %v687_v28 = vadd.f32 %v1094_v23, %v927_v63  ;;  %v843_v22 = vsub.s32 %v840_v13, %v1318_v34  ;;  %v854_v23 = vadd.s32 4294967192, %v1316_v33 }
 0x272   :  { %v681_v25 = vpop.f32.mrf.mxu0 }
 0x273   :  { %v682_v26 = vadd.f32 %v927_v63, %v681_v25  ;;  %750 = vperm.xlu1 %1105, %v677_v24   ;;  %v857_v32 = vsub.s32 %v854_v23, %v1318_v34 }
 0x274   :  { %v1097_v27 = vpop.f32.mrf.mxu0 }
 0x275   :  { %753 = vperm.xlu0 %1104, %v682_v26   ;;  %v697_v31 = vadd.f32 %v1097_v27, %v927_v63  ;;  %v850_v27 = vsub.s32 %v847_v18, %v1318_v34 }
 0x276   :  { %v691_v29 = vpop.f32.mrf.mxu0 }
 0x277   :  { %v692_v30 = vadd.f32 %v927_v63, %v691_v29  ;;  %756 = vperm.xlu1 %1105, %v687_v28   ;;  %v861_v28 = vadd.s32 4294967184, %v1316_v33 }
 0x279   :  { %759 = vperm.xlu0 %1104, %v692_v30  }
 0x27b   :  { %762 = vperm.xlu1 %1105, %v697_v31  }
 0x2d6   :  { %v721_v36 = vpop.permute.xlu0 %720 }
 0x2d7   :  { %v774_v50 = vrot.slane %v721_v36, %v773_v41 }
 0x2da   :  { %v727_v42 = vpop.permute.xlu1 %726  ;;  %v718_v43 = vpop.permute.xlu0 %717 }
 0x2db   :  { %v769_v47 = vrot.slane %v718_v43, %v768_v39  ;;  %v788_v55 = vrot.slane %v727_v42, %v787_v46  ;;  %v864_v39 = vsub.s32 %v861_v28, %v1318_v34  ;;  %v871_v43 = vsub.s32 %v868_v35, %v1318_v34 }
 0x2dd   :  { %v776_v56 = vsel %vm775_vm3, %v774_v50, %v769_v47 }
 0x2de   :  { %v724_v51 = vpop.permute.xlu1 %723 }
 0x2df   :  { %v781_v52 = vrot.slane %v724_v51, %v780_v44 }
 0x2e0   :  { %v730_v57 = vpop.permute.xlu0 %729 }
 0x2e1   :  { %v783_v58 = vsel %vm782_vm4, %v781_v52, %v776_v56  ;;  %v795_v59 = vrot.slane %v730_v57, %v794_v48 }
 0x2e2   :  { %v790_v62 = vsel %vm789_vm5, %v788_v55, %v783_v58  ;;  %v733_v63 = vpop.permute.xlu1 %732 }
 0x2e3   :  { %v797_v0 = vsel %vm796_vm6, %v795_v59, %v790_v62  ;;  %v802_v1 = vrot.slane %v733_v63, %v801_v53 }
 0x2e4   :  { %v736_v4 = vpop.permute.xlu0 %735 }
 0x2e5   :  { %v804_v5 = vsel %vm803_vm7, %v802_v1, %v797_v0  ;;  %v809_v6 = vrot.slane %v736_v4, %v808_v60 }
 0x2e6   :  { %v739_v9 = vpop.permute.xlu1 %738 }
 0x2e7   :  { %v811_v10 = vsel %vm810_vm8, %v809_v6, %v804_v5  ;;  %v816_v11 = vrot.slane %v739_v9, %v815_v2 }
 0x2e8   :  { %v742_v14 = vpop.permute.xlu0 %741 }
 0x2e9   :  { %v818_v15 = vsel %vm817_vm9, %v816_v11, %v811_v10  ;;  %v823_v16 = vrot.slane %v742_v14, %v822_v7 }
 0x2ea   :  { %v745_v19 = vpop.permute.xlu1 %744 }
 0x2eb   :  { %v825_v20 = vsel %vm824_vm10, %v823_v16, %v818_v15  ;;  %v830_v21 = vrot.slane %v745_v19, %v829_v12 }
 0x2ec   :  { %v748_v24 = vpop.permute.xlu0 %747 }
 0x2ed   :  { %v832_v25 = vsel %vm831_vm11, %v830_v21, %v825_v20  ;;  %v837_v26 = vrot.slane %v748_v24, %v836_v17 }
 0x2ee   :  { %v751_v29 = vpop.permute.xlu1 %750 }
 0x2ef   :  { %v839_v30 = vsel %vm838_vm12, %v837_v26, %v832_v25  ;;  %v844_v31 = vrot.slane %v751_v29, %v843_v22 }
 0x2f0   :  { %v754_v36 = vpop.permute.xlu0 %753 }
 0x2f1   :  { %v846_v37 = vsel %vm845_vm13, %v844_v31, %v839_v30  ;;  %v851_v38 = vrot.slane %v754_v36, %v850_v27 }
 0x2f2   :  { %v757_v40 = vpop.permute.xlu1 %756 }
 0x2f3   :  { %v853_v41 = vsel %vm852_vm14, %v851_v38, %v846_v37  ;;  %v858_v42 = vrot.slane %v757_v40, %v857_v32 }
 0x2f4   :  { %v760_v44 = vpop.permute.xlu0 %759 }
 0x2f5   :  { %v860_v45 = vsel %vm859_vm15, %v858_v42, %v853_v41  ;;  %v865_v46 = vrot.slane %v760_v44, %v864_v39 }
 0x2f6   :  { %v763_v47 = vpop.permute.xlu1 %762 }
 0x2f7   :  { %v872_v33 = vrot.slane %v763_v47, %v871_v43  ;;  %v867_v48 = vsel %vm866_vm0, %v865_v46, %v860_v45 }
 0x2f9   :  { %v874_v49 = vsel %vm873_vm1, %v872_v33, %v867_v48 }
 0x2fa   :  { %876 = vst [vmem:[#allocation3] sm:$0x1] %v874_v49 }
 0x2fb   :  { %1117 = shalt.err (!%p1114_p4)
}
 0x2fc   :  { %886 = dma.vmem_to_hbm [thread:$0]  %s884_s5, 16, %s1362_s7, [#allocation4]  }
 0x2fd   :  { %1126 = dma.done.wait [#allocation4], 16  }
 0x2fe   :  { %1127 = vsyncadd [#allocation4], 4294967280 }
 0x2ff   :  { %890 = vsyncpa [#allocation4], 1 }

</bundles_post_ra>
